<compile_context>
chip_gen: v5e
topology: v5e:2x2
jax: 0.10.0
libtpu: 0.0.40
codegen_flags: <defaults>
</compile_context>

<pallas_src>
import jax
import jax.numpy as jnp
from jax.experimental import pallas as pl
from jax.experimental.pallas import tpu as pltpu

_LANE = 128
_SUBLANE = 8


def _linear_fn_kernel(w_ref, b_ref, x_ref, o_ref):
    # w_ref, b_ref: (1,) scalars in SMEM.  x_ref/o_ref: (tm, cols) VMEM tiles.
    w = w_ref[0]
    b = b_ref[0]
    o_ref[...] = (w * x_ref[...] + b).astype(o_ref.dtype)


def _round_up(v: int, m: int) -> int:
    return ((v + m - 1) // m) * m


def linear_function_model(
    x: jax.Array,
    weights: jax.Array,
    bias: jax.Array,
    *,
    tile_bytes: int = 4 << 20,   # per-buffer VMEM budget for the row tile
    max_cols: int = 8192,        # widest lane-dense block to consider
    donate: bool = False,        # alias output onto input when dtypes match
) -> jax.Array:
    """Pallas equivalent of: weights * x + bias (scalar weight/bias, elementwise)."""
    orig_shape = x.shape
    # Matches PyTorch promotion (f32 params keep the output in f32 even for bf16 x).
    out_dtype = jnp.result_type(x.dtype, weights.dtype, bias.dtype)

    # Defensive: accept 0-d or (1,) parameters.
    w = jnp.asarray(weights).reshape((1,))
    b = jnp.asarray(bias).reshape((1,))

    n = x.size
    if n == 0:
        return jnp.zeros(orig_shape, out_dtype)

    # --- lane-dense 2-D layout; pad-and-slice when numel % 128 != 0 ---------
    x_flat = x.reshape(-1)
    if n % _LANE != 0:
        n_pad = _round_up(n, _SUBLANE * _LANE)
        x_flat = jnp.pad(x_flat, (0, n_pad - n))
    else:
        n_pad = n

    cols = _LANE
    for c in (8192, 4096, 2048, 1024, 512, 256, 128):
        if c <= max_cols and n_pad % c == 0:
            cols = c
            break
    rows = n_pad // cols
    x2 = x_flat.reshape(rows, cols)

    # --- row tile from a byte budget (multiple of 8 unless it spans all rows)
    elem_bytes = max(x2.dtype.itemsize, jnp.dtype(out_dtype).itemsize)
    tm = max(1, tile_bytes // (cols * elem_bytes))
    if tm >= rows:
        if rows >= 2 * _SUBLANE:
            # Split a would-be single block into >=2 balanced "parallel" steps
            # so v7x's two TensorCores (and their DMA streams) both run.
            tm = _round_up(-(-rows // 2), _SUBLANE)
        else:
            tm = rows
    else:
        tm = max(_SUBLANE, (tm // _SUBLANE) * _SUBLANE)
    grid = (pl.cdiv(rows, tm),)
    # Partial last row-block (rows % tm != 0) relies on Pallas's implicit OOB
    # padding/masking — correct for this elementwise op (no reduction).

    # Pure bandwidth op: 2 flops/elem, read + write traffic.
    bytes_accessed = n_pad * (x2.dtype.itemsize + jnp.dtype(out_dtype).itemsize)
    cost = pl.CostEstimate(flops=2 * n_pad, transcendentals=0, bytes_accessed=bytes_accessed)

    # 2x input + 2x output double buffers + headroom; explicit limit keeps the
    # enlarged tiles safe under v5e's 16 MiB scoped default while staying well
    # below every generation's physical VMEM (>= 64 MiB).
    tile_buf_bytes = tm * cols * (x2.dtype.itemsize + jnp.dtype(out_dtype).itemsize)
    vmem_limit = int(min(max(2 * tile_buf_bytes + (2 << 20), 32 << 20), 48 << 20))

    io_aliases = {}
    if donate and x2.dtype == jnp.dtype(out_dtype):
        io_aliases = {2: 0}  # alias x tile buffer onto the output

    out2 = pl.pallas_call(
        _linear_fn_kernel,
        out_shape=jax.ShapeDtypeStruct((rows, cols), out_dtype),
        grid_spec=pltpu.PrefetchScalarGridSpec(
            num_scalar_prefetch=0,
            grid=grid,
            in_specs=[
                pl.BlockSpec(memory_space=pltpu.SMEM),        # weights (1,)
                pl.BlockSpec(memory_space=pltpu.SMEM),        # bias    (1,)
                pl.BlockSpec((tm, cols), lambda i: (i, 0)),   # x tile
            ],
            out_specs=pl.BlockSpec((tm, cols), lambda i: (i, 0)),
        ),
        compiler_params=pltpu.CompilerParams(
            dimension_semantics=("parallel",),
            vmem_limit_bytes=vmem_limit,
        ),
        cost_estimate=cost,
        input_output_aliases=io_aliases,
    )(w, b, x2)

    if n_pad != n:
        return out2.reshape(-1)[:n].reshape(orig_shape)
    return out2.reshape(orig_shape)


if __name__ == "__main__":
    key = jax.random.PRNGKey(0)
    k_x, k_w, k_b, k_y, k_z = jax.random.split(key, 5)

    # Parameters matching nn.Parameter(torch.randn(1)) shapes.
    weights = jax.random.normal(k_w, (1,), dtype=jnp.float32)
    bias = jax.random.normal(k_b, (1,), dtype=jnp.float32)

    # 1) small 4-D input, default tiling (single lane-dense block)
    x = jax.random.normal(k_x, (2, 4, 16, 16), dtype=jnp.float32)
    ref = weights[0] * x + bias[0]
    out = jax.block_until_ready(linear_function_model(x, weights, bias))
    assert out.shape == x.shape and out.dtype == ref.dtype
    assert jnp.allclose(out, ref, atol=1e-6, rtol=1e-6), "mismatch (default tiling)"

    # 2) numel not a multiple of 128 -> exercises the pad-and-slice path
    y = jax.random.normal(k_y, (3, 5, 7), dtype=jnp.float32)
    ref_y = weights[0] * y + bias[0]
    out_y = jax.block_until_ready(linear_function_model(y, weights, bias))
    assert out_y.shape == y.shape
    assert jnp.allclose(out_y, ref_y, atol=1e-6, rtol=1e-6), "mismatch (padded path)"

    # 3) force a multi-step pipelined grid (narrow cols, tiny tile budget)
    z = jax.random.normal(k_z, (4, 4, 32, 32), dtype=jnp.float32)
    ref_z = weights[0] * z + bias[0]
    out_z = jax.block_until_ready(
        linear_function_model(z, weights, bias, tile_bytes=32 * 1024, max_cols=128)
    )
    assert jnp.allclose(out_z, ref_z, atol=1e-6, rtol=1e-6), "mismatch (multi-step grid)"

    # 4) 0-d scalar parameters (defensive reshape path)
    out_s = jax.block_until_ready(linear_function_model(x, weights[0], bias[0]))
    assert jnp.allclose(out_s, ref, atol=1e-6, rtol=1e-6), "mismatch (0-d params)"

    print("KERNEL_OK")
</pallas_src>

<mosaic_0001>
module attributes {stable_mosaic.version = 11 : i64} {
  func.func @_linear_fn_kernel(%arg0: i32, %arg1: memref<1xf32, #tpu.memory_space<smem>>, %arg2: memref<1xf32, #tpu.memory_space<smem>>, %arg3: memref<1x2048xf32, #tpu.memory_space<vmem>>, %arg4: memref<1x2048xf32, #tpu.memory_space<vmem>>) attributes {dimension_semantics = [#tpu.dimension_semantics<parallel>], iteration_bounds = array<i64: 1>, scalar_prefetch = 0 : i64, scratch_operands = 0 : i64, tpu.core_type = #tpu.core_type<tc>, window_params = [{transform_indices = @transform_0, window_bounds = array<i64: 1>}, {transform_indices = @transform_1, window_bounds = array<i64: 1>}, {transform_indices = @transform_2, window_bounds = array<i64: 1, 2048>}, {transform_indices = @transform_3, window_bounds = array<i64: 1, 2048>}]} {
    %c0 = arith.constant 0 : index
    %0 = memref.load %arg1[%c0] : memref<1xf32, #tpu.memory_space<smem>>
    %c0_0 = arith.constant 0 : index
    %1 = memref.load %arg2[%c0_0] : memref<1xf32, #tpu.memory_space<smem>>
    %c0_1 = arith.constant 0 : index
    %c0_2 = arith.constant 0 : index
    %2 = vector.load %arg3[%c0_1, %c0_2] : memref<1x2048xf32, #tpu.memory_space<vmem>>, vector<1x2048xf32>
    %3 = vector.broadcast %0 : f32 to vector<1x2048xf32>
    %4 = arith.mulf %3, %2 : vector<1x2048xf32>
    %5 = vector.broadcast %1 : f32 to vector<1x2048xf32>
    %6 = arith.addf %4, %5 : vector<1x2048xf32>
    %c0_3 = arith.constant 0 : index
    %c0_4 = arith.constant 0 : index
    %7 = vector.load %arg4[%c0_3, %c0_4] : memref<1x2048xf32, #tpu.memory_space<vmem>>, vector<1x2048xf32>
    tpu.vector_store %arg4[%c0_3, %c0_4], %6 {strides = array<i32>} : memref<1x2048xf32, #tpu.memory_space<vmem>>, vector<1x2048xf32>,
    return
  }
  func.func @transform_0(%arg0: i32) -> i32 {
    %c0_i32 = arith.constant 0 : i32
    %c0_i32_0 = arith.constant 0 : i32
    return %c0_i32 : i32
  }
  func.func @transform_1(%arg0: i32) -> i32 {
    %c0_i32 = arith.constant 0 : i32
    %c0_i32_0 = arith.constant 0 : i32
    return %c0_i32 : i32
  }
  func.func @transform_2(%arg0: i32) -> (i32, i32) {
    %c0_i32 = arith.constant 0 : i32
    %c0_i32_0 = arith.constant 0 : i32
    return %arg0, %c0_i32 : i32, i32
  }
  func.func @transform_3(%arg0: i32) -> (i32, i32) {
    %c0_i32 = arith.constant 0 : i32
    %c0_i32_0 = arith.constant 0 : i32
    return %arg0, %c0_i32 : i32, i32
  }
}

</mosaic_0001>

<bundles_post_ra>
// kernel: tpu_custom_call.1
= control target key start
LH: loop header
LB: loop body
LE: loop exit
PB: predicated region body
PF: predicated region fallthrough
CT: control target
= control target key end

     0   :  { %10 = vsyncpa [#allocation5], 0  ;;  %s148_s0 = inlined_call_operand.<no memory space> [shape: f32[1], index: 0, kind: input, shape index: {}]   ;;  %s149_s1 = inlined_call_operand.<no memory space> [shape: f32[1], index: 1, kind: input, shape index: {}]   ;;  %s150_s2 = inlined_call_operand.hbm [shape: f32[1,2048], index: 2, kind: input, shape index: {}]   ;;  %s151_s3 = inlined_call_operand.hbm [shape: f32[1,2048], index: 3, kind: output, shape index: {}]  }
   0x1   :  { %11 = vsyncpa [#allocation6], 0  ;;  %s21_s14 = sshll.u32 %s150_s2, 4  ;;  %s114_s15 = smov [#allocation4]   ;;  %s22_s14 = int_to_ptr.hbm [resolvable:$true] %s21_s14 }
   0x2   :  { %s23_s16 = sshll.u32 %s114_s15, 4  ;;  %s24_s16 = int_to_ptr.vmem [resolvable:$true] %s23_s16 }
   0x3   :  { %26 = dma.hbm_to_vmem [thread:$0]  %s22_s14, 256, %s24_s16, [#allocation5]  }
   0x4   :  { %110 = dma.done.wait [#allocation5], 256  }
   0x5   :  { %111 = vsyncadd [#allocation5], 4294967040  ;;  %v35_v0 = vstv %s148_s0  ;;  %v33_v1 = vld [vmem:[#allocation4] sm:$0xff]  ;;  %v38_v2 = vstv %s149_s1  ;;  %v34_v3 = vld [vmem:[#allocation4 + $0x8] sm:$0xff]  ;;  %s115_s2 = smov [#allocation7]   ;;  %s50_s24 = sshll.u32 %s151_s3, 4  ;;  %s51_s24 = int_to_ptr.hbm [resolvable:$true] %s50_s24 }
   0x6   :  { %v36_v4 = vmul.f32 %v35_v0, %v33_v1  ;;  %v37_v5 = vmul.f32 %v35_v0, %v34_v3  ;;  %s48_s21 = sshll.u32 %s115_s2, 4  ;;  %s49_s21 = int_to_ptr.vmem [resolvable:$true] %s48_s21 }
   0x8   :  { %v39_v6 = vadd.f32 %v38_v2, %v36_v4  ;;  %v40_v7 = vadd.f32 %v38_v2, %v37_v5 }
   0xa   :  { %41 = vst [vmem:[#allocation7] sm:$0xff] %v39_v6 }
   0xb   :  { %42 = vst [vmem:[#allocation7 + $0x8] sm:$0xff] %v40_v7 }
   0xc   :  { %53 = dma.vmem_to_hbm [thread:$0]  %s49_s21, 256, %s51_s24, [#allocation6]  }
   0xd   :  { %112 = dma.done.wait [#allocation6], 256  }
   0xe   :  { %113 = vsyncadd [#allocation6], 4294967040 }
   0xf   :  { %58 = vsyncpa [#allocation5], 1 }
  0x10   :  { %59 = vsyncpa [#allocation6], 1 }

</bundles_post_ra>
